<compile_context>
chip_gen: v6e
topology: v6e:2x2x1
jax: 0.10.0
libtpu: 0.0.40
codegen_flags: <defaults>
</compile_context>

<pallas_src>
import jax
import jax.numpy as jnp
from jax.experimental import pallas as pl
from jax.experimental.pallas import tpu as pltpu


# ----------------------------------------------------------------------------
# Pallas kernels
# ----------------------------------------------------------------------------
def conv_pool_kernel(p_ref, w_ref, b_ref, o_ref):
    """Fused conv-as-GEMM + bias + ReLU + 2x2 maxpool.

    p_ref : (4, K, M)   patch matrices for the 4 pool-window offsets, M = N*POH*POW
    w_ref : (Cout, K)   flattened conv weights
    b_ref : (Cout, 1)   bias (broadcast over the lane-dense spatial axis)
    o_ref : (Cout, M)   pooled, ReLU'd output (lane-dense)
    """
    w = w_ref[...]
    m = jnp.dot(w, p_ref[0], preferred_element_type=jnp.float32)
    for d in range(1, 4):
        m = jnp.maximum(m, jnp.dot(w, p_ref[d], preferred_element_type=jnp.float32))
    o_ref[...] = jnp.maximum(m + b_ref[...], 0.0)


def fc_stack_kernel(x_ref, w1_ref, b1_ref, w2_ref, b2_ref, w3_ref, b3_ref, o_ref):
    """fc1 -> ReLU -> fc2 -> ReLU -> fc3, all intermediates stay in VMEM."""
    h = jnp.dot(x_ref[...], w1_ref[...], preferred_element_type=jnp.float32) + b1_ref[...]
    h = jnp.maximum(h, 0.0)
    h = jnp.dot(h, w2_ref[...], preferred_element_type=jnp.float32) + b2_ref[...]
    h = jnp.maximum(h, 0.0)
    o_ref[...] = jnp.dot(h, w3_ref[...], preferred_element_type=jnp.float32) + b3_ref[...]


# ----------------------------------------------------------------------------
# Pallas wrappers (single full-VMEM block per call — whole net is < 1 MiB)
# ----------------------------------------------------------------------------
def conv_pool_block(patches, w_mat, b_col):
    """patches: (4, K, M), w_mat: (Cout, K), b_col: (Cout, 1) -> (Cout, M)."""
    d4, k, m = patches.shape
    cout = w_mat.shape[0]
    return pl.pallas_call(
        conv_pool_kernel,
        out_shape=jax.ShapeDtypeStruct((cout, m), jnp.float32),
        grid=(1,),
        in_specs=[
            pl.BlockSpec((d4, k, m), lambda i: (0, 0, 0)),
            pl.BlockSpec((cout, k), lambda i: (0, 0)),
            pl.BlockSpec((cout, 1), lambda i: (0, 0)),
        ],
        out_specs=pl.BlockSpec((cout, m), lambda i: (0, 0)),
        compiler_params=pltpu.CompilerParams(dimension_semantics=("arbitrary",)),
    )(patches, w_mat, b_col)


def fc_stack(x, w1, b1, w2, b2, w3, b3):
    """x: (N, 400) -> (N, 10); all three Linear layers in one kernel."""
    n, k1 = x.shape
    h1, h2, h3 = w1.shape[1], w2.shape[1], w3.shape[1]
    return pl.pallas_call(
        fc_stack_kernel,
        out_shape=jax.ShapeDtypeStruct((n, h3), jnp.float32),
        grid=(1,),
        in_specs=[
            pl.BlockSpec((n, k1), lambda i: (0, 0)),
            pl.BlockSpec((k1, h1), lambda i: (0, 0)),
            pl.BlockSpec((1, h1), lambda i: (0, 0)),
            pl.BlockSpec((h1, h2), lambda i: (0, 0)),
            pl.BlockSpec((1, h2), lambda i: (0, 0)),
            pl.BlockSpec((h2, h3), lambda i: (0, 0)),
            pl.BlockSpec((1, h3), lambda i: (0, 0)),
        ],
        out_specs=pl.BlockSpec((n, h3), lambda i: (0, 0)),
        compiler_params=pltpu.CompilerParams(dimension_semantics=("arbitrary",)),
    )(x, w1, b1, w2, b2, w3, b3)


# ----------------------------------------------------------------------------
# XLA glue: pooled im2col (strided window gather only; no compute)
# ----------------------------------------------------------------------------
def pooled_conv_patches(x, kh, kw):
    """x: (N, Cin, H, W) -> (4, Cin*kh*kw, N*POH*POW).

    Leading axis enumerates the four 2x2-pool window offsets (di, dj);
    K axis is ordered (ci, ki, kj) to match the (Cout, Cin*KH*KW) weight
    flattening; M axis is ordered (n, po, pw).
    """
    n, cin, h, w = x.shape
    oh, ow = h - kh + 1, w - kw + 1
    poh, pow_ = oh // 2, ow // 2
    # Full im2col stack at conv resolution: (N, Cin, kh*kw, OH, OW)
    pt = jnp.stack(
        [x[:, :, ki:ki + oh, kj:kj + ow] for ki in range(kh) for kj in range(kw)],
        axis=2,
    )
    pt = pt.transpose(1, 2, 0, 3, 4)  # (Cin, kh*kw, N, OH, OW)
    offs = []
    for di in range(2):
        for dj in range(2):
            offs.append(
                pt[:, :, :, di::2, dj::2].reshape(cin * kh * kw, n * poh * pow_)
            )
    return jnp.stack(offs, axis=0)  # (4, K, M)


# ----------------------------------------------------------------------------
# Parameter init (deterministic, PyTorch-like fan-in uniform); weights are
# stored in kernel-friendly layouts: conv (Cout, Cin*KH*KW) / (Cout, 1),
# FC pre-transposed (K_in, K_out) / (1, K_out).
# ----------------------------------------------------------------------------
def init_params(key):
    def uniform(key, shape, fan_in):
        bound = 1.0 / jnp.sqrt(jnp.float32(fan_in))
        return jax.random.uniform(key, shape, jnp.float32, -bound, bound)

    keys = jax.random.split(key, 10)
    return {
        "conv1_w": uniform(keys[0], (6, 1 * 5 * 5), 1 * 5 * 5),
        "conv1_b": uniform(keys[1], (6, 1), 1 * 5 * 5),
        "conv2_w": uniform(keys[2], (16, 6 * 5 * 5), 6 * 5 * 5),
        "conv2_b": uniform(keys[3], (16, 1), 6 * 5 * 5),
        "fc1_w": uniform(keys[4], (400, 120), 400),
        "fc1_b": uniform(keys[5], (1, 120), 400),
        "fc2_w": uniform(keys[6], (120, 84), 120),
        "fc2_b": uniform(keys[7], (1, 84), 120),
        "fc3_w": uniform(keys[8], (84, 10), 84),
        "fc3_b": uniform(keys[9], (1, 10), 84),
    }


# ----------------------------------------------------------------------------
# Forward pass (mirrors Net.forward)
# ----------------------------------------------------------------------------
@jax.jit
def net_forward(params, x):
    # x: (N, 1, 32, 32) NCHW float32
    n = x.shape[0]

    # Stage 1: conv1(5x5) + ReLU + maxpool2x2  -> (N, 6, 14, 14)
    p1 = pooled_conv_patches(x, 5, 5)                              # (4, 25, N*196)
    c1 = conv_pool_block(p1, params["conv1_w"], params["conv1_b"])  # (6, N*196)
    h1 = c1.reshape(6, n, 14, 14).transpose(1, 0, 2, 3)             # (N, 6, 14, 14)

    # Stage 2: conv2(5x5) + ReLU + maxpool2x2  -> (N, 16, 5, 5)
    p2 = pooled_conv_patches(h1, 5, 5)                              # (4, 150, N*25)
    c2 = conv_pool_block(p2, params["conv2_w"], params["conv2_b"])  # (16, N*25)
    h2 = c2.reshape(16, n, 5, 5).transpose(1, 0, 2, 3).reshape(n, 16 * 5 * 5)  # (N, 400)

    # Stage 3: fc1 -> ReLU -> fc2 -> ReLU -> fc3, one fused kernel -> (N, 10)
    return fc_stack(
        h2,
        params["fc1_w"], params["fc1_b"],
        params["fc2_w"], params["fc2_b"],
        params["fc3_w"], params["fc3_b"],
    )


# ----------------------------------------------------------------------------
# Pure-JAX reference (same math as the PyTorch module) for validation
# ----------------------------------------------------------------------------
def reference_forward(params, x):
    def conv_relu(inp, w_mat, b_col, cin, k):
        cout = w_mat.shape[0]
        w = w_mat.reshape(cout, cin, k, k)
        y = jax.lax.conv_general_dilated(
            inp, w, (1, 1), "VALID", dimension_numbers=("NCHW", "OIHW", "NCHW"))
        return jax.nn.relu(y + b_col.reshape(1, cout, 1, 1))

    def pool2x2(y):
        n, c, h, w = y.shape
        return y.reshape(n, c, h // 2, 2, w // 2, 2).max(axis=(3, 5))

    y = pool2x2(conv_relu(x, params["conv1_w"], params["conv1_b"], 1, 5))
    y = pool2x2(conv_relu(y, params["conv2_w"], params["conv2_b"], 6, 5))
    y = y.reshape(y.shape[0], -1)
    y = jax.nn.relu(y @ params["fc1_w"] + params["fc1_b"])
    y = jax.nn.relu(y @ params["fc2_w"] + params["fc2_b"])
    return y @ params["fc3_w"] + params["fc3_b"]


if __name__ == "__main__":
    key = jax.random.PRNGKey(0)
    pkey, xkey = jax.random.split(key)
    params = init_params(pkey)
    # LeNet geometry requires 32x32 single-channel input; batch=2.
    x = jax.random.normal(xkey, (2, 1, 32, 32), dtype=jnp.float32)

    out = jax.block_until_ready(net_forward(params, x))
    assert out.shape == (2, 10), out.shape

    ref = jax.block_until_ready(reference_forward(params, x))
    assert bool(jnp.allclose(out, ref, rtol=2e-2, atol=2e-2)), (out, ref)

    print("KERNEL_OK")
</pallas_src>

<mosaic_0001>
module attributes {stable_mosaic.version = 11 : i64} {
  func.func @conv_pool_kernel(%arg0: i32, %arg1: memref<4x25x392xf32, #tpu.memory_space<vmem>>, %arg2: memref<6x25xf32, #tpu.memory_space<vmem>>, %arg3: memref<6x1xf32, #tpu.memory_space<vmem>>, %arg4: memref<6x392xf32, #tpu.memory_space<vmem>>) attributes {dimension_semantics = [#tpu.dimension_semantics<arbitrary>], iteration_bounds = array<i64: 1>, scalar_prefetch = 0 : i64, scratch_operands = 0 : i64, tpu.core_type = #tpu.core_type<tc>, window_params = [{pipeline_mode = #tpu.pipeline_mode<synchronous>, transform_indices = @transform_0, window_bounds = array<i64: 4, 25, 392>}, {pipeline_mode = #tpu.pipeline_mode<synchronous>, transform_indices = @transform_1, window_bounds = array<i64: 6, 25>}, {pipeline_mode = #tpu.pipeline_mode<synchronous>, transform_indices = @transform_2, window_bounds = array<i64: 6, 1>}, {pipeline_mode = #tpu.pipeline_mode<synchronous>, transform_indices = @transform_3, window_bounds = array<i64: 6, 392>}]} {
    %c0 = arith.constant 0 : index
    %c0_0 = arith.constant 0 : index
    %0 = vector.load %arg2[%c0, %c0_0] : memref<6x25xf32, #tpu.memory_space<vmem>>, vector<6x25xf32>
    %c0_1 = arith.constant 0 : index
    %c0_2 = arith.constant 0 : index
    %c0_3 = arith.constant 0 : index
    %1 = vector.load %arg1[%c0_1, %c0_2, %c0_3] : memref<4x25x392xf32, #tpu.memory_space<vmem>>, vector<1x25x392xf32>
    %2 = vector.shape_cast %1 : vector<1x25x392xf32> to vector<25x392xf32>
    %cst = arith.constant dense<0.000000e+00> : vector<6x392xf32>
    %3 = tpu.matmul %0, %2, %cst {dimension_numbers = #tpu.dot_dimension_numbers<[1], [0], [0], [1], [0, 0, 1, 1], [], []>} : vector<6x25xf32>, vector<25x392xf32>, vector<6x392xf32> -> vector<6x392xf32>
    %c1 = arith.constant 1 : index
    %c0_4 = arith.constant 0 : index
    %c0_5 = arith.constant 0 : index
    %4 = vector.load %arg1[%c1, %c0_4, %c0_5] : memref<4x25x392xf32, #tpu.memory_space<vmem>>, vector<1x25x392xf32>
    %5 = vector.shape_cast %4 : vector<1x25x392xf32> to vector<25x392xf32>
    %cst_6 = arith.constant dense<0.000000e+00> : vector<6x392xf32>
    %6 = tpu.matmul %0, %5, %cst_6 {dimension_numbers = #tpu.dot_dimension_numbers<[1], [0], [0], [1], [0, 0, 1, 1], [], []>} : vector<6x25xf32>, vector<25x392xf32>, vector<6x392xf32> -> vector<6x392xf32>
    %7 = arith.maximumf %3, %6 : vector<6x392xf32>
    %c2 = arith.constant 2 : index
    %c0_7 = arith.constant 0 : index
    %c0_8 = arith.constant 0 : index
    %8 = vector.load %arg1[%c2, %c0_7, %c0_8] : memref<4x25x392xf32, #tpu.memory_space<vmem>>, vector<1x25x392xf32>
    %9 = vector.shape_cast %8 : vector<1x25x392xf32> to vector<25x392xf32>
    %cst_9 = arith.constant dense<0.000000e+00> : vector<6x392xf32>
    %10 = tpu.matmul %0, %9, %cst_9 {dimension_numbers = #tpu.dot_dimension_numbers<[1], [0], [0], [1], [0, 0, 1, 1], [], []>} : vector<6x25xf32>, vector<25x392xf32>, vector<6x392xf32> -> vector<6x392xf32>
    %11 = arith.maximumf %7, %10 : vector<6x392xf32>
    %c3 = arith.constant 3 : index
    %c0_10 = arith.constant 0 : index
    %c0_11 = arith.constant 0 : index
    %12 = vector.load %arg1[%c3, %c0_10, %c0_11] : memref<4x25x392xf32, #tpu.memory_space<vmem>>, vector<1x25x392xf32>
    %13 = vector.shape_cast %12 : vector<1x25x392xf32> to vector<25x392xf32>
    %cst_12 = arith.constant dense<0.000000e+00> : vector<6x392xf32>
    %14 = tpu.matmul %0, %13, %cst_12 {dimension_numbers = #tpu.dot_dimension_numbers<[1], [0], [0], [1], [0, 0, 1, 1], [], []>} : vector<6x25xf32>, vector<25x392xf32>, vector<6x392xf32> -> vector<6x392xf32>
    %15 = arith.maximumf %11, %14 : vector<6x392xf32>
    %c0_13 = arith.constant 0 : index
    %c0_14 = arith.constant 0 : index
    %16 = vector.load %arg3[%c0_13, %c0_14] : memref<6x1xf32, #tpu.memory_space<vmem>>, vector<6x1xf32>
    %17 = vector.broadcast %16 : vector<6x1xf32> to vector<6x392xf32>
    %18 = arith.addf %15, %17 : vector<6x392xf32>
    %cst_15 = arith.constant 0.000000e+00 : f32
    %19 = vector.broadcast %cst_15 : f32 to vector<6x392xf32>
    %20 = arith.maximumf %18, %19 : vector<6x392xf32>
    %c0_16 = arith.constant 0 : index
    %c0_17 = arith.constant 0 : index
    %21 = vector.load %arg4[%c0_16, %c0_17] : memref<6x392xf32, #tpu.memory_space<vmem>>, vector<6x392xf32>
    tpu.vector_store %arg4[%c0_16, %c0_17], %20 {strides = array<i32>} : memref<6x392xf32, #tpu.memory_space<vmem>>, vector<6x392xf32>,
    return
  }
  func.func @transform_0(%arg0: i32) -> (i32, i32, i32) {
    %c0_i32 = arith.constant 0 : i32
    %c0_i32_0 = arith.constant 0 : i32
    %c0_i32_1 = arith.constant 0 : i32
    %c0_i32_2 = arith.constant 0 : i32
    return %c0_i32, %c0_i32_0, %c0_i32_1 : i32, i32, i32
  }
  func.func @transform_1(%arg0: i32) -> (i32, i32) {
    %c0_i32 = arith.constant 0 : i32
    %c0_i32_0 = arith.constant 0 : i32
    %c0_i32_1 = arith.constant 0 : i32
    return %c0_i32, %c0_i32_0 : i32, i32
  }
  func.func @transform_2(%arg0: i32) -> (i32, i32) {
    %c0_i32 = arith.constant 0 : i32
    %c0_i32_0 = arith.constant 0 : i32
    %c0_i32_1 = arith.constant 0 : i32
    return %c0_i32, %c0_i32_0 : i32, i32
  }
  func.func @transform_3(%arg0: i32) -> (i32, i32) {
    %c0_i32 = arith.constant 0 : i32
    %c0_i32_0 = arith.constant 0 : i32
    %c0_i32_1 = arith.constant 0 : i32
    return %c0_i32, %c0_i32_0 : i32, i32
  }
}

module attributes {stable_mosaic.version = 11 : i64} {
  func.func @conv_pool_kernel(%arg0: i32, %arg1: memref<4x150x50xf32, #tpu.memory_space<vmem>>, %arg2: memref<16x150xf32, #tpu.memory_space<vmem>>, %arg3: memref<16x1xf32, #tpu.memory_space<vmem>>, %arg4: memref<16x50xf32, #tpu.memory_space<vmem>>) attributes {dimension_semantics = [#tpu.dimension_semantics<arbitrary>], iteration_bounds = array<i64: 1>, scalar_prefetch = 0 : i64, scratch_operands = 0 : i64, tpu.core_type = #tpu.core_type<tc>, window_params = [{pipeline_mode = #tpu.pipeline_mode<synchronous>, transform_indices = @transform_0, window_bounds = array<i64: 4, 150, 50>}, {pipeline_mode = #tpu.pipeline_mode<synchronous>, transform_indices = @transform_1, window_bounds = array<i64: 16, 150>}, {pipeline_mode = #tpu.pipeline_mode<synchronous>, transform_indices = @transform_2, window_bounds = array<i64: 16, 1>}, {pipeline_mode = #tpu.pipeline_mode<synchronous>, transform_indices = @transform_3, window_bounds = array<i64: 16, 50>}]} {
    %c0 = arith.constant 0 : index
    %c0_0 = arith.constant 0 : index
    %0 = vector.load %arg2[%c0, %c0_0] : memref<16x150xf32, #tpu.memory_space<vmem>>, vector<16x150xf32>
    %c0_1 = arith.constant 0 : index
    %c0_2 = arith.constant 0 : index
    %c0_3 = arith.constant 0 : index
    %1 = vector.load %arg1[%c0_1, %c0_2, %c0_3] : memref<4x150x50xf32, #tpu.memory_space<vmem>>, vector<1x150x50xf32>
    %2 = vector.shape_cast %1 : vector<1x150x50xf32> to vector<150x50xf32>
    %cst = arith.constant dense<0.000000e+00> : vector<16x50xf32>
    %3 = tpu.matmul %0, %2, %cst {dimension_numbers = #tpu.dot_dimension_numbers<[1], [0], [0], [1], [0, 0, 1, 1], [], []>} : vector<16x150xf32>, vector<150x50xf32>, vector<16x50xf32> -> vector<16x50xf32>
    %c1 = arith.constant 1 : index
    %c0_4 = arith.constant 0 : index
    %c0_5 = arith.constant 0 : index
    %4 = vector.load %arg1[%c1, %c0_4, %c0_5] : memref<4x150x50xf32, #tpu.memory_space<vmem>>, vector<1x150x50xf32>
    %5 = vector.shape_cast %4 : vector<1x150x50xf32> to vector<150x50xf32>
    %cst_6 = arith.constant dense<0.000000e+00> : vector<16x50xf32>
    %6 = tpu.matmul %0, %5, %cst_6 {dimension_numbers = #tpu.dot_dimension_numbers<[1], [0], [0], [1], [0, 0, 1, 1], [], []>} : vector<16x150xf32>, vector<150x50xf32>, vector<16x50xf32> -> vector<16x50xf32>
    %7 = arith.maximumf %3, %6 : vector<16x50xf32>
    %c2 = arith.constant 2 : index
    %c0_7 = arith.constant 0 : index
    %c0_8 = arith.constant 0 : index
    %8 = vector.load %arg1[%c2, %c0_7, %c0_8] : memref<4x150x50xf32, #tpu.memory_space<vmem>>, vector<1x150x50xf32>
    %9 = vector.shape_cast %8 : vector<1x150x50xf32> to vector<150x50xf32>
    %cst_9 = arith.constant dense<0.000000e+00> : vector<16x50xf32>
    %10 = tpu.matmul %0, %9, %cst_9 {dimension_numbers = #tpu.dot_dimension_numbers<[1], [0], [0], [1], [0, 0, 1, 1], [], []>} : vector<16x150xf32>, vector<150x50xf32>, vector<16x50xf32> -> vector<16x50xf32>
    %11 = arith.maximumf %7, %10 : vector<16x50xf32>
    %c3 = arith.constant 3 : index
    %c0_10 = arith.constant 0 : index
    %c0_11 = arith.constant 0 : index
    %12 = vector.load %arg1[%c3, %c0_10, %c0_11] : memref<4x150x50xf32, #tpu.memory_space<vmem>>, vector<1x150x50xf32>
    %13 = vector.shape_cast %12 : vector<1x150x50xf32> to vector<150x50xf32>
    %cst_12 = arith.constant dense<0.000000e+00> : vector<16x50xf32>
    %14 = tpu.matmul %0, %13, %cst_12 {dimension_numbers = #tpu.dot_dimension_numbers<[1], [0], [0], [1], [0, 0, 1, 1], [], []>} : vector<16x150xf32>, vector<150x50xf32>, vector<16x50xf32> -> vector<16x50xf32>
    %15 = arith.maximumf %11, %14 : vector<16x50xf32>
    %c0_13 = arith.constant 0 : index
    %c0_14 = arith.constant 0 : index
    %16 = vector.load %arg3[%c0_13, %c0_14] : memref<16x1xf32, #tpu.memory_space<vmem>>, vector<16x1xf32>
    %17 = vector.broadcast %16 : vector<16x1xf32> to vector<16x50xf32>
    %18 = arith.addf %15, %17 : vector<16x50xf32>
    %cst_15 = arith.constant 0.000000e+00 : f32
    %19 = vector.broadcast %cst_15 : f32 to vector<16x50xf32>
    %20 = arith.maximumf %18, %19 : vector<16x50xf32>
    %c0_16 = arith.constant 0 : index
    %c0_17 = arith.constant 0 : index
    %21 = vector.load %arg4[%c0_16, %c0_17] : memref<16x50xf32, #tpu.memory_space<vmem>>, vector<16x50xf32>
    tpu.vector_store %arg4[%c0_16, %c0_17], %20 {strides = array<i32>} : memref<16x50xf32, #tpu.memory_space<vmem>>, vector<16x50xf32>,
    return
  }
  func.func @transform_0(%arg0: i32) -> (i32, i32, i32) {
    %c0_i32 = arith.constant 0 : i32
    %c0_i32_0 = arith.constant 0 : i32
    %c0_i32_1 = arith.constant 0 : i32
    %c0_i32_2 = arith.constant 0 : i32
    return %c0_i32, %c0_i32_0, %c0_i32_1 : i32, i32, i32
  }
  func.func @transform_1(%arg0: i32) -> (i32, i32) {
    %c0_i32 = arith.constant 0 : i32
    %c0_i32_0 = arith.constant 0 : i32
    %c0_i32_1 = arith.constant 0 : i32
    return %c0_i32, %c0_i32_0 : i32, i32
  }
  func.func @transform_2(%arg0: i32) -> (i32, i32) {
    %c0_i32 = arith.constant 0 : i32
    %c0_i32_0 = arith.constant 0 : i32
    %c0_i32_1 = arith.constant 0 : i32
    return %c0_i32, %c0_i32_0 : i32, i32
  }
  func.func @transform_3(%arg0: i32) -> (i32, i32) {
    %c0_i32 = arith.constant 0 : i32
    %c0_i32_0 = arith.constant 0 : i32
    %c0_i32_1 = arith.constant 0 : i32
    return %c0_i32, %c0_i32_0 : i32, i32
  }
}

module attributes {stable_mosaic.version = 11 : i64} {
  func.func @fc_stack_kernel(%arg0: i32, %arg1: memref<2x400xf32, #tpu.memory_space<vmem>>, %arg2: memref<400x120xf32, #tpu.memory_space<vmem>>, %arg3: memref<1x120xf32, #tpu.memory_space<vmem>>, %arg4: memref<120x84xf32, #tpu.memory_space<vmem>>, %arg5: memref<1x84xf32, #tpu.memory_space<vmem>>, %arg6: memref<84x10xf32, #tpu.memory_space<vmem>>, %arg7: memref<1x10xf32, #tpu.memory_space<vmem>>, %arg8: memref<2x10xf32, #tpu.memory_space<vmem>>) attributes {dimension_semantics = [#tpu.dimension_semantics<arbitrary>], iteration_bounds = array<i64: 1>, scalar_prefetch = 0 : i64, scratch_operands = 0 : i64, tpu.core_type = #tpu.core_type<tc>, window_params = [{pipeline_mode = #tpu.pipeline_mode<synchronous>, transform_indices = @transform_0, window_bounds = array<i64: 2, 400>}, {pipeline_mode = #tpu.pipeline_mode<synchronous>, transform_indices = @transform_1, window_bounds = array<i64: 400, 120>}, {pipeline_mode = #tpu.pipeline_mode<synchronous>, transform_indices = @transform_2, window_bounds = array<i64: 1, 120>}, {pipeline_mode = #tpu.pipeline_mode<synchronous>, transform_indices = @transform_3, window_bounds = array<i64: 120, 84>}, {pipeline_mode = #tpu.pipeline_mode<synchronous>, transform_indices = @transform_4, window_bounds = array<i64: 1, 84>}, {pipeline_mode = #tpu.pipeline_mode<synchronous>, transform_indices = @transform_5, window_bounds = array<i64: 84, 10>}, {pipeline_mode = #tpu.pipeline_mode<synchronous>, transform_indices = @transform_6, window_bounds = array<i64: 1, 10>}, {pipeline_mode = #tpu.pipeline_mode<synchronous>, transform_indices = @transform_7, window_bounds = array<i64: 2, 10>}]} {
    %c0 = arith.constant 0 : index
    %c0_0 = arith.constant 0 : index
    %0 = vector.load %arg1[%c0, %c0_0] : memref<2x400xf32, #tpu.memory_space<vmem>>, vector<2x400xf32>
    %c0_1 = arith.constant 0 : index
    %c0_2 = arith.constant 0 : index
    %1 = vector.load %arg2[%c0_1, %c0_2] : memref<400x120xf32, #tpu.memory_space<vmem>>, vector<400x120xf32>
    %cst = arith.constant dense<0.000000e+00> : vector<2x120xf32>
    %2 = tpu.matmul %0, %1, %cst {dimension_numbers = #tpu.dot_dimension_numbers<[1], [0], [0], [1], [0, 0, 1, 1], [], []>} : vector<2x400xf32>, vector<400x120xf32>, vector<2x120xf32> -> vector<2x120xf32>
    %c0_3 = arith.constant 0 : index
    %c0_4 = arith.constant 0 : index
    %3 = vector.load %arg3[%c0_3, %c0_4] : memref<1x120xf32, #tpu.memory_space<vmem>>, vector<1x120xf32>
    %4 = vector.broadcast %3 : vector<1x120xf32> to vector<2x120xf32>
    %5 = arith.addf %2, %4 : vector<2x120xf32>
    %cst_5 = arith.constant 0.000000e+00 : f32
    %6 = vector.broadcast %cst_5 : f32 to vector<2x120xf32>
    %7 = arith.maximumf %5, %6 : vector<2x120xf32>
    %c0_6 = arith.constant 0 : index
    %c0_7 = arith.constant 0 : index
    %8 = vector.load %arg4[%c0_6, %c0_7] : memref<120x84xf32, #tpu.memory_space<vmem>>, vector<120x84xf32>
    %cst_8 = arith.constant dense<0.000000e+00> : vector<2x84xf32>
    %9 = tpu.matmul %7, %8, %cst_8 {dimension_numbers = #tpu.dot_dimension_numbers<[1], [0], [0], [1], [0, 0, 1, 1], [], []>} : vector<2x120xf32>, vector<120x84xf32>, vector<2x84xf32> -> vector<2x84xf32>
    %c0_9 = arith.constant 0 : index
    %c0_10 = arith.constant 0 : index
    %10 = vector.load %arg5[%c0_9, %c0_10] : memref<1x84xf32, #tpu.memory_space<vmem>>, vector<1x84xf32>
    %11 = vector.broadcast %10 : vector<1x84xf32> to vector<2x84xf32>
    %12 = arith.addf %9, %11 : vector<2x84xf32>
    %cst_11 = arith.constant 0.000000e+00 : f32
    %13 = vector.broadcast %cst_11 : f32 to vector<2x84xf32>
    %14 = arith.maximumf %12, %13 : vector<2x84xf32>
    %c0_12 = arith.constant 0 : index
    %c0_13 = arith.constant 0 : index
    %15 = vector.load %arg6[%c0_12, %c0_13] : memref<84x10xf32, #tpu.memory_space<vmem>>, vector<84x10xf32>
    %cst_14 = arith.constant dense<0.000000e+00> : vector<2x10xf32>
    %16 = tpu.matmul %14, %15, %cst_14 {dimension_numbers = #tpu.dot_dimension_numbers<[1], [0], [0], [1], [0, 0, 1, 1], [], []>} : vector<2x84xf32>, vector<84x10xf32>, vector<2x10xf32> -> vector<2x10xf32>
    %c0_15 = arith.constant 0 : index
    %c0_16 = arith.constant 0 : index
    %17 = vector.load %arg7[%c0_15, %c0_16] : memref<1x10xf32, #tpu.memory_space<vmem>>, vector<1x10xf32>
    %18 = vector.broadcast %17 : vector<1x10xf32> to vector<2x10xf32>
    %19 = arith.addf %16, %18 : vector<2x10xf32>
    %c0_17 = arith.constant 0 : index
    %c0_18 = arith.constant 0 : index
    %20 = vector.load %arg8[%c0_17, %c0_18] : memref<2x10xf32, #tpu.memory_space<vmem>>, vector<2x10xf32>
    tpu.vector_store %arg8[%c0_17, %c0_18], %19 {strides = array<i32>} : memref<2x10xf32, #tpu.memory_space<vmem>>, vector<2x10xf32>,
    return
  }
  func.func @transform_0(%arg0: i32) -> (i32, i32) {
    %c0_i32 = arith.constant 0 : i32
    %c0_i32_0 = arith.constant 0 : i32
    %c0_i32_1 = arith.constant 0 : i32
    return %c0_i32, %c0_i32_0 : i32, i32
  }
  func.func @transform_1(%arg0: i32) -> (i32, i32) {
    %c0_i32 = arith.constant 0 : i32
    %c0_i32_0 = arith.constant 0 : i32
    %c0_i32_1 = arith.constant 0 : i32
    return %c0_i32, %c0_i32_0 : i32, i32
  }
  func.func @transform_2(%arg0: i32) -> (i32, i32) {
    %c0_i32 = arith.constant 0 : i32
    %c0_i32_0 = arith.constant 0 : i32
    %c0_i32_1 = arith.constant 0 : i32
    return %c0_i32, %c0_i32_0 : i32, i32
  }
  func.func @transform_3(%arg0: i32) -> (i32, i32) {
    %c0_i32 = arith.constant 0 : i32
    %c0_i32_0 = arith.constant 0 : i32
    %c0_i32_1 = arith.constant 0 : i32
    return %c0_i32, %c0_i32_0 : i32, i32
  }
  func.func @transform_4(%arg0: i32) -> (i32, i32) {
    %c0_i32 = arith.constant 0 : i32
    %c0_i32_0 = arith.constant 0 : i32
    %c0_i32_1 = arith.constant 0 : i32
    return %c0_i32, %c0_i32_0 : i32, i32
  }
  func.func @transform_5(%arg0: i32) -> (i32, i32) {
    %c0_i32 = arith.constant 0 : i32
    %c0_i32_0 = arith.constant 0 : i32
    %c0_i32_1 = arith.constant 0 : i32
    return %c0_i32, %c0_i32_0 : i32, i32
  }
  func.func @transform_6(%arg0: i32) -> (i32, i32) {
    %c0_i32 = arith.constant 0 : i32
    %c0_i32_0 = arith.constant 0 : i32
    %c0_i32_1 = arith.constant 0 : i32
    return %c0_i32, %c0_i32_0 : i32, i32
  }
  func.func @transform_7(%arg0: i32) -> (i32, i32) {
    %c0_i32 = arith.constant 0 : i32
    %c0_i32_0 = arith.constant 0 : i32
    %c0_i32_1 = arith.constant 0 : i32
    return %c0_i32, %c0_i32_0 : i32, i32
  }
}

</mosaic_0001>

<bundles_post_ra>
// kernel: net_forward.3
= control target key start
LH: loop header
LB: loop body
LE: loop exit
PB: predicated region body
PF: predicated region fallthrough
CT: control target
= control target key end

     0   :  { %vm35_vm0 = vcmask 1040384   ;;  %v813_v3 = vmov 0.0   ;;  %vm31_vm1 = vcmask 203776   ;;  %vm732_vm2 = vcmask 62464   ;;  %s1087_s0 = inlined_call_operand.vmem [shape: f32[4,25,392], index: 0, kind: input, shape index: {}]   ;;  %s1088_s1 = inlined_call_operand.vmem [shape: f32[6,25], index: 1, kind: input, shape index: {}]   ;;  %s1089_s2 = inlined_call_operand.vmem [shape: f32[6,1], index: 2, kind: input, shape index: {}]   ;;  %s1090_s3 = inlined_call_operand.vmem [shape: f32[6,392], index: 3, kind: output, shape index: {}]  }
   0x1   :  { %v28_v0 = vld [vmem:[%s1087_s0 + $0x68] sm:$0x1]  ;;  %v30_v1 = vld [vmem:[%s1087_s0 + $0x78] sm:$0x1]  ;;  %v27_v2 = vld [vmem:[%s1087_s0 + $0x60] sm:$0x1]  ;;  %112 = vmatprep.mubr.f32.mxu0 %v813_v3  ;;  %183 = vmatprep.mubr.f32.mxu1 %v813_v3 }
   0x2   :  { %738 = vmatprep.subr.msk.mxu0 %vm35_vm0, %v28_v0  ;;  %741 = vmatprep.subr.msk.mxu1 %vm35_vm0, %v30_v1  ;;  %v29_v4 = vld [vmem:[%s1087_s0 + $0x70] sm:$0x1]  ;;  %v24_v5 = vld [vmem:[%s1087_s0 + $0x48] sm:$0xff]  ;;  %v26_v6 = vld [vmem:[%s1087_s0 + $0x58] sm:$0xff] }
   0x3   :  { %739 = vmatpush1.msk.msra.mxu0 %vm35_vm0, %v27_v2  ;;  %742 = vmatpush1.msk.msra.mxu1 %vm35_vm0, %v29_v4  ;;  %v23_v7 = vld [vmem:[%s1087_s0 + $0x40] sm:$0xff]  ;;  %v25_v8 = vld [vmem:[%s1087_s0 + $0x50] sm:$0xff]  ;;  %v20_v9 = vld [vmem:[%s1087_s0 + $0x28] sm:$0xff]  ;;  %v814_v4 = vmov 0  }
   0x4   :  { %74 = vmatprep.subr.mxu0 %v24_v5  ;;  %145 = vmatprep.subr.mxu1 %v26_v6  ;;  %v22_v10 = vld [vmem:[%s1087_s0 + $0x38] sm:$0xff]  ;;  %v19_v11 = vld [vmem:[%s1087_s0 + $0x20] sm:$0xff]  ;;  %v21_v12 = vld [vmem:[%s1087_s0 + $0x30] sm:$0xff] }
   0x5   :  { %75 = vmatpush1.msra.mxu0 %v23_v7  ;;  %146 = vmatpush1.msra.mxu1 %v25_v8  ;;  %v16_v13 = vld [vmem:[%s1087_s0 + $0x8] sm:$0xff]  ;;  %v18_v14 = vld [vmem:[%s1087_s0 + $0x18] sm:$0xff]  ;;  %v15_v15 = vld [vmem:[%s1087_s0] sm:$0xff] }
   0x6   :  { %76 = vmatprep.subr.mxu0 %v20_v9  ;;  %147 = vmatprep.subr.mxu1 %v22_v10  ;;  %v17_v16 = vld [vmem:[%s1087_s0 + $0x10] sm:$0xff]  ;;  %v892_v17 = vld [vmem:[%s1088_s1] sm:$0x3f]  ;;  %v757_v18 = vld [vmem:[%s1087_s0 + $0xe8] sm:$0x1] }
   0x7   :  { %77 = vmatpush1.msra.mxu0 %v19_v11  ;;  %148 = vmatpush1.msra.mxu1 %v21_v12  ;;  %v759_v19 = vld [vmem:[%s1087_s0 + $0xf8] sm:$0x1]  ;;  %v756_v20 = vld [vmem:[%s1087_s0 + $0xe0] sm:$0x1]  ;;  %v758_v21 = vld [vmem:[%s1087_s0 + $0xf0] sm:$0x1] }
   0x8   :  { %78 = vmatprep.subr.mxu0 %v16_v13  ;;  %149 = vmatprep.subr.mxu1 %v18_v14  ;;  %v753_v22 = vld [vmem:[%s1087_s0 + $0xc8] sm:$0xff]  ;;  %v755_v23 = vld [vmem:[%s1087_s0 + $0xd8] sm:$0xff]  ;;  %v752_v24 = vld [vmem:[%s1087_s0 + $0xc0] sm:$0xff] }
   0x9   :  { %79 = vmatpush1.msra.mxu0 %v15_v15  ;;  %150 = vmatpush1.msra.mxu1 %v17_v16  ;;  %v754_v25 = vld [vmem:[%s1087_s0 + $0xd0] sm:$0xff]  ;;  %v749_v26 = vld [vmem:[%s1087_s0 + $0xa8] sm:$0xff]  ;;  %v751_v27 = vld [vmem:[%s1087_s0 + $0xb8] sm:$0xff] }
   0xa   :  { %740 = vmatmul.mubr.msk.f32.vlgmr.msra.gmra.mxu0 %vm31_vm1, %v892_v17  ;;  %743 = vmatmul.mubr.msk.f32.vlgmr.msra.gmra.mxu1 %vm31_vm1, %v892_v17  ;;  %v748_v28 = vld [vmem:[%s1087_s0 + $0xa0] sm:$0xff]  ;;  %v750_v29 = vld [vmem:[%s1087_s0 + $0xb0] sm:$0xff]  ;;  %v745_v30 = vld [vmem:[%s1087_s0 + $0x88] sm:$0xff] }
   0xb   :  { %760 = vmatprep.subr.msk.mxu0 %vm35_vm0, %v757_v18  ;;  %763 = vmatprep.subr.msk.mxu1 %vm35_vm0, %v759_v19  ;;  %v747_v31 = vld [vmem:[%s1087_s0 + $0x98] sm:$0xff]  ;;  %v744_v32 = vld [vmem:[%s1087_s0 + $0x80] sm:$0xff]  ;;  %v746_v33 = vld [vmem:[%s1087_s0 + $0x90] sm:$0xff] }
   0xc   :  { %761 = vmatpush1.msk.msra.mxu0 %vm35_vm0, %v756_v20  ;;  %764 = vmatpush1.msk.msra.mxu1 %vm35_vm0, %v758_v21  ;;  %v779_v34 = vld [vmem:[%s1087_s0 + $0x168] sm:$0x1]  ;;  %v781_v35 = vld [vmem:[%s1087_s0 + $0x178] sm:$0x1]  ;;  %v778_v36 = vld [vmem:[%s1087_s0 + $0x160] sm:$0x1] }
   0xd   :  { %245 = vmatprep.subr.mxu0 %v753_v22  ;;  %316 = vmatprep.subr.mxu1 %v755_v23  ;;  %v780_v37 = vld [vmem:[%s1087_s0 + $0x170] sm:$0x1]  ;;  %v775_v38 = vld [vmem:[%s1087_s0 + $0x148] sm:$0xff]  ;;  %v777_v39 = vld [vmem:[%s1087_s0 + $0x158] sm:$0xff] }
   0xe   :  { %246 = vmatpush1.msra.mxu0 %v752_v24  ;;  %317 = vmatpush1.msra.mxu1 %v754_v25  ;;  %v774_v40 = vld [vmem:[%s1087_s0 + $0x140] sm:$0xff]  ;;  %v776_v41 = vld [vmem:[%s1087_s0 + $0x150] sm:$0xff]  ;;  %v771_v42 = vld [vmem:[%s1087_s0 + $0x128] sm:$0xff] }
   0xf   :  { %247 = vmatprep.subr.mxu0 %v749_v26  ;;  %318 = vmatprep.subr.mxu1 %v751_v27  ;;  %v773_v43 = vld [vmem:[%s1087_s0 + $0x138] sm:$0xff]  ;;  %v770_v44 = vld [vmem:[%s1087_s0 + $0x120] sm:$0xff]  ;;  %v772_v45 = vld [vmem:[%s1087_s0 + $0x130] sm:$0xff] }
  0x10   :  { %248 = vmatpush1.msra.mxu0 %v748_v28  ;;  %319 = vmatpush1.msra.mxu1 %v750_v29  ;;  %v767_v46 = vld [vmem:[%s1087_s0 + $0x108] sm:$0xff]  ;;  %v769_v47 = vld [vmem:[%s1087_s0 + $0x118] sm:$0xff]  ;;  %v766_v48 = vld [vmem:[%s1087_s0 + $0x100] sm:$0xff] }
  0x11   :  { %249 = vmatprep.subr.mxu0 %v745_v30  ;;  %320 = vmatprep.subr.mxu1 %v747_v31  ;;  %v768_v49 = vld [vmem:[%s1087_s0 + $0x110] sm:$0xff]  ;;  %v801_v50 = vld [vmem:[%s1087_s0 + $0x1e8] sm:$0x1]  ;;  %v803_v51 = vld [vmem:[%s1087_s0 + $0x1f8] sm:$0x1] }
  0x12   :  { %250 = vmatpush1.msra.mxu0 %v744_v32  ;;  %283 = vmatprep.mubr.f32.mxu0 %v813_v3  ;;  %v800_v52 = vld [vmem:[%s1087_s0 + $0x1e0] sm:$0x1]  ;;  %v802_v53 = vld [vmem:[%s1087_s0 + $0x1f0] sm:$0x1]  ;;  %v797_v54 = vld [vmem:[%s1087_s0 + $0x1c8] sm:$0xff] }
  0x13   :  { %321 = vmatpush1.msra.mxu1 %v746_v33  ;;  %354 = vmatprep.mubr.f32.mxu1 %v813_v3  ;;  %v799_v55 = vld [vmem:[%s1087_s0 + $0x1d8] sm:$0xff]  ;;  %v796_v56 = vld [vmem:[%s1087_s0 + $0x1c0] sm:$0xff]  ;;  %v798_v57 = vld [vmem:[%s1087_s0 + $0x1d0] sm:$0xff] }
  0x14   :  { %762 = vmatmul.mubr.msk.f32.vlgmr.msra.gmra.mxu0 %vm31_vm1, %v892_v17  ;;  %765 = vmatmul.mubr.msk.f32.vlgmr.msra.gmra.mxu1 %vm31_vm1, %v892_v17  ;;  %v793_v58 = vld [vmem:[%s1087_s0 + $0x1a8] sm:$0xff]  ;;  %v795_v59 = vld [vmem:[%s1087_s0 + $0x1b8] sm:$0xff]  ;;  %v792_v60 = vld [vmem:[%s1087_s0 + $0x1a0] sm:$0xff] }
  0x15   :  { %782 = vmatprep.subr.msk.mxu0 %vm35_vm0, %v779_v34  ;;  %785 = vmatprep.subr.msk.mxu1 %vm35_vm0, %v781_v35  ;;  %v794_v61 = vld [vmem:[%s1087_s0 + $0x1b0] sm:$0xff]  ;;  %v789_v62 = vld [vmem:[%s1087_s0 + $0x188] sm:$0xff]  ;;  %v791_v63 = vld [vmem:[%s1087_s0 + $0x198] sm:$0xff] }
  0x16   :  { %783 = vmatpush1.msk.msra.mxu0 %vm35_vm0, %v778_v36  ;;  %786 = vmatpush1.msk.msra.mxu1 %vm35_vm0, %v780_v37  ;;  %v788_v0 = vld [vmem:[%s1087_s0 + $0x180] sm:$0xff]  ;;  %v790_v1 = vld [vmem:[%s1087_s0 + $0x190] sm:$0xff] }
  0x17   :  { %420 = vmatprep.subr.mxu0 %v775_v38  ;;  %491 = vmatprep.subr.mxu1 %v777_v39  ;;  %v715_v2 = vld [vmem:[%s1089_s2] sm:$0x3f] }
  0x18   :  { %421 = vmatpush1.msra.mxu0 %v774_v40  ;;  %492 = vmatpush1.msra.mxu1 %v776_v41 }
  0x19   :  { %422 = vmatprep.subr.mxu0 %v771_v42  ;;  %493 = vmatprep.subr.mxu1 %v773_v43 }
  0x1a   :  { %423 = vmatpush1.msra.mxu0 %v770_v44  ;;  %494 = vmatpush1.msra.mxu1 %v772_v45 }
  0x1b   :  { %424 = vmatprep.subr.mxu0 %v767_v46  ;;  %495 = vmatprep.subr.mxu1 %v769_v47 }
  0x1c   :  { %425 = vmatpush1.msra.mxu0 %v766_v48  ;;  %458 = vmatprep.mubr.f32.mxu0 %v813_v3 }
  0x1d   :  { %496 = vmatpush1.msra.mxu1 %v768_v49  ;;  %529 = vmatprep.mubr.f32.mxu1 %v813_v3 }
  0x1e   :  { %784 = vmatmul.mubr.msk.f32.vlgmr.msra.gmra.mxu0 %vm31_vm1, %v892_v17  ;;  %787 = vmatmul.mubr.msk.f32.vlgmr.msra.gmra.mxu1 %vm31_vm1, %v892_v17 }
  0x1f   :  { %804 = vmatprep.subr.msk.mxu0 %vm35_vm0, %v801_v50  ;;  %807 = vmatprep.subr.msk.mxu1 %vm35_vm0, %v803_v51 }
  0x20   :  { %805 = vmatpush1.msk.msra.mxu0 %vm35_vm0, %v800_v52  ;;  %808 = vmatpush1.msk.msra.mxu1 %vm35_vm0, %v802_v53 }
  0x21   :  { %595 = vmatprep.subr.mxu0 %v797_v54  ;;  %666 = vmatprep.subr.mxu1 %v799_v55 }
  0x22   :  { %596 = vmatpush1.msra.mxu0 %v796_v56  ;;  %667 = vmatpush1.msra.mxu1 %v798_v57 }
  0x23   :  { %597 = vmatprep.subr.mxu0 %v793_v58  ;;  %668 = vmatprep.subr.mxu1 %v795_v59 }
  0x24   :  { %598 = vmatpush1.msra.mxu0 %v792_v60  ;;  %669 = vmatpush1.msra.mxu1 %v794_v61 }
  0x25   :  { %599 = vmatprep.subr.mxu0 %v789_v62  ;;  %670 = vmatprep.subr.mxu1 %v791_v63 }
  0x26   :  { %600 = vmatpush1.msra.mxu0 %v788_v0  ;;  %633 = vmatprep.mubr.f32.mxu0 %v813_v3 }
  0x27   :  { %671 = vmatpush1.msra.mxu1 %v790_v1  ;;  %704 = vmatprep.mubr.f32.mxu1 %v813_v3 }
  0x28   :  { %806 = vmatmul.mubr.msk.f32.vlgmr.msra.gmra.mxu0 %vm31_vm1, %v892_v17  ;;  %809 = vmatmul.mubr.msk.f32.vlgmr.msra.gmra.mxu1 %vm31_vm1, %v892_v17 }
  0x29   :  { %812 = vset.pattern.permute.xlu0 %v814_v4 }
  0x2a   :  { %718 = vperm.xlu0 %812, %v715_v2  }
  0xa5   :  { %v719_v22 = vpop.permute.xlu0 %718 }
  0xca   :  { %v114_v5 = vpop.f32.mrf.mxu0  ;;  %v185_v6 = vpop.f32.mrf.mxu1 }
  0xcc   :  { %v116_v7 = vpop.f32.mrf.mxu0  ;;  %v187_v8 = vpop.f32.mrf.mxu1 }
  0xd4   :  { %v285_v9 = vpop.f32.mrf.mxu0  ;;  %v356_v10 = vpop.f32.mrf.mxu1 }
  0xd5   :  { %v361_v14 = vmax.f32 %v114_v5, %v285_v9  ;;  %v363_v15 = vmax.f32 %v185_v6, %v356_v10 }
  0xd6   :  { %v287_v3 = vpop.f32.mrf.mxu0  ;;  %v358_v11 = vpop.f32.mrf.mxu1 }
  0xd7   :  { %v362_v19 = vmax.f32 %v116_v7, %v287_v3  ;;  %v364_v20 = vmax.f32 %v187_v8, %v358_v11 }
  0xde   :  { %v460_v12 = vpop.f32.mrf.mxu0  ;;  %v531_v13 = vpop.f32.mrf.mxu1 }
  0xdf   :  { %v536_v17 = vmax.f32 %v361_v14, %v460_v12  ;;  %v538_v21 = vmax.f32 %v363_v15, %v531_v13 }
  0xe0   :  { %v462_v16 = vpop.f32.mrf.mxu0  ;;  %v533_v18 = vpop.f32.mrf.mxu1 }
  0xe1   :  { %v537_v25 = vmax.f32 %v362_v19, %v462_v16  ;;  %v539_v26 = vmax.f32 %v364_v20, %v533_v18 }
  0xe8   :  { %v635_v23 = vpop.f32.mrf.mxu0  ;;  %v706_v24 = vpop.f32.mrf.mxu1 }
  0xe9   :  { %v711_v27 = vmax.f32 %v536_v17, %v635_v23  ;;  %v713_v28 = vmax.f32 %v538_v21, %v706_v24 }
  0xea   :  { %v637_v29 = vpop.f32.mrf.mxu0  ;;  %v708_v30 = vpop.f32.mrf.mxu1 }
  0xeb   :  { %v721_v31 = vadd.f32 %v719_v22, %v711_v27  ;;  %v723_v32 = vadd.f32 %v719_v22, %v713_v28  ;;  %v712_v33 = vmax.f32 %v537_v25, %v637_v29  ;;  %v714_v34 = vmax.f32 %v539_v26, %v708_v30 }
  0xed   :  { %v725_v35 = vmax.f32 %v721_v31, 0.0  ;;  %v727_v36 = vmax.f32 %v723_v32, 0.0  ;;  %v722_v37 = vadd.f32 %v719_v22, %v712_v33  ;;  %v724_v38 = vadd.f32 %v719_v22, %v714_v34 }
  0xef   :  { %729 = vst [vmem:[%s1090_s3] sm:$0x3f] %v725_v35  ;;  %731 = vst [vmem:[%s1090_s3 + $0x10] sm:$0x3f] %v727_v36  ;;  %v726_v39 = vmax.f32 %v722_v37, 0.0  ;;  %v728_v40 = vmax.f32 %v724_v38, 0.0 }
  0xf1   :  { %730 = vst [vmem:[%s1090_s3 + $0x8] sm:$0x3f] %v726_v39  ;;  %733 = vst.msk [vmem:[%s1090_s3 + $0x18] sm:$0x3f] %vm732_vm2, %v728_v40 }

// kernel: net_forward.4
= control target key start
LH: loop header
LB: loop body
LE: loop exit
PB: predicated region body
PF: predicated region fallthrough
CT: control target
= control target key end

     0   :  { %v518_v0 = vmov 0.0   ;;  %vm44_vm0 = vcmask 1045504   ;;  %vm37_vm1 = vcmask 179200   ;;  %vm439_vm2 = vcmask 408576   ;;  %s892_s0 = inlined_call_operand.vmem [shape: f32[4,150,50], index: 0, kind: input, shape index: {}]   ;;  %s893_s1 = inlined_call_operand.vmem [shape: f32[16,150], index: 1, kind: input, shape index: {}]   ;;  %s894_s2 = inlined_call_operand.vmem [shape: f32[16,1], index: 2, kind: input, shape index: {}]   ;;  %s895_s3 = inlined_call_operand.vmem [shape: f32[16,50], index: 3, kind: output, shape index: {}]  }
   0x1   :  { %48 = vmatprep.subr.mxu0 %v518_v0  ;;  %146 = vmatprep.subr.mxu1 %v518_v0  ;;  %v33_v1 = vld [vmem:[%s892_s0 + $0x78] sm:$0xff]  ;;  %v464_v2 = vld [vmem:[%s892_s0 + $0x110] sm:$0xff]  ;;  %v463_v4 = vld [vmem:[%s892_s0 + $0x108] sm:$0xff] }
   0x2   :  { %v32_v3 = vld [vmem:[%s892_s0 + $0x70] sm:$0xff]  ;;  %49 = vmatpush1.msra.mxu0 %v33_v1  ;;  %147 = vmatpush1.msra.mxu1 %v464_v2  ;;  %v31_v5 = vld [vmem:[%s892_s0 + $0x68] sm:$0xff]  ;;  %v462_v6 = vld [vmem:[%s892_s0 + $0x100] sm:$0xff] }
   0x3   :  { %50 = vmatprep.subr.mxu0 %v518_v0  ;;  %148 = vmatprep.subr.mxu1 %v518_v0  ;;  %v30_v7 = vld [vmem:[%s892_s0 + $0x60] sm:$0xff]  ;;  %v461_v8 = vld [vmem:[%s892_s0 + $0xf8] sm:$0xff]  ;;  %v460_v10 = vld [vmem:[%s892_s0 + $0xf0] sm:$0xff] }
   0x4   :  { %51 = vmatpush1.msra.mxu0 %v32_v3  ;;  %149 = vmatpush1.msra.mxu1 %v463_v4  ;;  %v29_v9 = vld [vmem:[%s892_s0 + $0x58] sm:$0xff]  ;;  %v28_v11 = vld [vmem:[%s892_s0 + $0x50] sm:$0xff]  ;;  %v459_v12 = vld [vmem:[%s892_s0 + $0xe8] sm:$0xff] }
   0x5   :  { %52 = vmatprep.subr.mxu0 %v518_v0  ;;  %150 = vmatprep.subr.mxu1 %v518_v0  ;;  %v27_v13 = vld [vmem:[%s892_s0 + $0x48] sm:$0xff]  ;;  %v458_v14 = vld [vmem:[%s892_s0 + $0xe0] sm:$0xff]  ;;  %v457_v16 = vld [vmem:[%s892_s0 + $0xd8] sm:$0xff] }
   0x6   :  { %53 = vmatpush1.msra.mxu0 %v31_v5  ;;  %151 = vmatpush1.msra.mxu1 %v462_v6  ;;  %v26_v15 = vld [vmem:[%s892_s0 + $0x40] sm:$0xff]  ;;  %v25_v17 = vld [vmem:[%s892_s0 + $0x38] sm:$0xff]  ;;  %v456_v18 = vld [vmem:[%s892_s0 + $0xd0] sm:$0xff] }
   0x7   :  { %54 = vmatprep.subr.mxu0 %v518_v0  ;;  %152 = vmatprep.subr.mxu1 %v518_v0  ;;  %v24_v19 = vld [vmem:[%s892_s0 + $0x30] sm:$0xff]  ;;  %v455_v20 = vld [vmem:[%s892_s0 + $0xc8] sm:$0xff]  ;;  %v454_v22 = vld [vmem:[%s892_s0 + $0xc0] sm:$0xff] }
   0x8   :  { %55 = vmatpush1.msra.mxu0 %v30_v7  ;;  %153 = vmatpush1.msra.mxu1 %v461_v8  ;;  %v23_v21 = vld [vmem:[%s892_s0 + $0x28] sm:$0xff]  ;;  %v22_v23 = vld [vmem:[%s892_s0 + $0x20] sm:$0xff]  ;;  %v453_v24 = vld [vmem:[%s892_s0 + $0xb8] sm:$0xff] }
   0x9   :  { %56 = vmatprep.subr.mxu0 %v518_v0  ;;  %154 = vmatprep.subr.mxu1 %v518_v0  ;;  %v21_v25 = vld [vmem:[%s892_s0 + $0x18] sm:$0xff]  ;;  %v452_v26 = vld [vmem:[%s892_s0 + $0xb0] sm:$0xff]  ;;  %v451_v28 = vld [vmem:[%s892_s0 + $0xa8] sm:$0xff] }
   0xa   :  { %57 = vmatpush1.msra.mxu0 %v29_v9  ;;  %155 = vmatpush1.msra.mxu1 %v460_v10  ;;  %v20_v27 = vld [vmem:[%s892_s0 + $0x10] sm:$0xff]  ;;  %v19_v29 = vld [vmem:[%s892_s0 + $0x8] sm:$0xff]  ;;  %v450_v30 = vld [vmem:[%s892_s0 + $0xa0] sm:$0xff] }
   0xb   :  { %58 = vmatprep.subr.mxu0 %v518_v0  ;;  %156 = vmatprep.subr.mxu1 %v518_v0  ;;  %v18_v31 = vld [vmem:[%s892_s0] sm:$0xff]  ;;  %v449_v32 = vld [vmem:[%s892_s0 + $0x98] sm:$0xff]  ;;  %v36_v33 = vld [vmem:[%s892_s0 + $0x90] sm:$0x3f] }
   0xc   :  { %59 = vmatpush1.msra.mxu0 %v28_v11  ;;  %157 = vmatpush1.msra.mxu1 %v459_v12  ;;  %v467_v34 = vld [vmem:[%s892_s0 + $0x128] sm:$0x3f]  ;;  %v466_v36 = vld [vmem:[%s892_s0 + $0x120] sm:$0xff]  ;;  %v465_v39 = vld [vmem:[%s892_s0 + $0x118] sm:$0xff] }
   0xd   :  { %60 = vmatprep.subr.mxu0 %v518_v0  ;;  %158 = vmatprep.subr.mxu1 %v518_v0  ;;  %v35_v35 = vld [vmem:[%s892_s0 + $0x88] sm:$0xff]  ;;  %v34_v37 = vld [vmem:[%s892_s0 + $0x80] sm:$0xff]  ;;  %v507_v44 = vld [vmem:[%s892_s0 + $0x238] sm:$0xff] }
   0xe   :  { %61 = vmatpush1.msra.mxu0 %v27_v13  ;;  %159 = vmatpush1.msra.mxu1 %v458_v14  ;;  %v692_v38 = vld [vmem:[%s893_s1 + $0x8] sm:$0xff]  ;;  %v700_v40 = vld [vmem:[%s893_s1] sm:$0xff]  ;;  %v484_v45 = vld [vmem:[%s892_s0 + $0x198] sm:$0xff] }
   0xf   :  { %62 = vmatprep.subr.mxu0 %v518_v0  ;;  %160 = vmatprep.subr.mxu1 %v518_v0  ;;  %v486_v41 = vld [vmem:[%s892_s0 + $0x1a8] sm:$0xff]  ;;  %v508_v42 = vld [vmem:[%s892_s0 + $0x240] sm:$0xff]  ;;  %v506_v46 = vld [vmem:[%s892_s0 + $0x230] sm:$0xff] }
  0x10   :  { %63 = vmatpush1.msra.mxu0 %v26_v15  ;;  %161 = vmatpush1.msra.mxu1 %v457_v16  ;;  %v485_v43 = vld [vmem:[%s892_s0 + $0x1a0] sm:$0xff]  ;;  %v483_v47 = vld [vmem:[%s892_s0 + $0x190] sm:$0xff]  ;;  %v505_v48 = vld [vmem:[%s892_s0 + $0x228] sm:$0xff] }
  0x11   :  { %64 = vmatprep.subr.mxu0 %v518_v0  ;;  %162 = vmatprep.subr.mxu1 %v518_v0  ;;  %v482_v49 = vld [vmem:[%s892_s0 + $0x188] sm:$0xff]  ;;  %v504_v50 = vld [vmem:[%s892_s0 + $0x220] sm:$0xff]  ;;  %v503_v52 = vld [vmem:[%s892_s0 + $0x218] sm:$0xff] }
  0x12   :  { %65 = vmatpush1.msra.mxu0 %v25_v17  ;;  %163 = vmatpush1.msra.mxu1 %v456_v18  ;;  %v481_v51 = vld [vmem:[%s892_s0 + $0x180] sm:$0xff]  ;;  %v480_v53 = vld [vmem:[%s892_s0 + $0x178] sm:$0xff]  ;;  %v502_v54 = vld [vmem:[%s892_s0 + $0x210] sm:$0xff] }
  0x13   :  { %66 = vmatprep.subr.mxu0 %v518_v0  ;;  %164 = vmatprep.subr.mxu1 %v518_v0  ;;  %v479_v55 = vld [vmem:[%s892_s0 + $0x170] sm:$0xff]  ;;  %v501_v56 = vld [vmem:[%s892_s0 + $0x208] sm:$0xff]  ;;  %v500_v58 = vld [vmem:[%s892_s0 + $0x200] sm:$0xff] }
  0x14   :  { %67 = vmatpush1.msra.mxu0 %v24_v19  ;;  %165 = vmatpush1.msra.mxu1 %v455_v20  ;;  %v478_v57 = vld [vmem:[%s892_s0 + $0x168] sm:$0xff]  ;;  %v477_v59 = vld [vmem:[%s892_s0 + $0x160] sm:$0xff]  ;;  %v499_v60 = vld [vmem:[%s892_s0 + $0x1f8] sm:$0xff] }
  0x15   :  { %68 = vmatprep.subr.mxu0 %v518_v0  ;;  %166 = vmatprep.subr.mxu1 %v518_v0  ;;  %v476_v61 = vld [vmem:[%s892_s0 + $0x158] sm:$0xff]  ;;  %v498_v62 = vld [vmem:[%s892_s0 + $0x1f0] sm:$0xff]  ;;  %v497_v1 = vld [vmem:[%s892_s0 + $0x1e8] sm:$0xff] }
  0x16   :  { %69 = vmatpush1.msra.mxu0 %v23_v21  ;;  %167 = vmatpush1.msra.mxu1 %v454_v22  ;;  %v475_v63 = vld [vmem:[%s892_s0 + $0x150] sm:$0xff]  ;;  %v474_v2 = vld [vmem:[%s892_s0 + $0x148] sm:$0xff]  ;;  %v496_v3 = vld [vmem:[%s892_s0 + $0x1e0] sm:$0xff] }
  0x17   :  { %70 = vmatprep.subr.mxu0 %v518_v0  ;;  %168 = vmatprep.subr.mxu1 %v518_v0  ;;  %v473_v4 = vld [vmem:[%s892_s0 + $0x140] sm:$0xff]  ;;  %v495_v5 = vld [vmem:[%s892_s0 + $0x1d8] sm:$0xff]  ;;  %v494_v7 = vld [vmem:[%s892_s0 + $0x1d0] sm:$0xff] }
  0x18   :  { %71 = vmatpush1.msra.mxu0 %v22_v23  ;;  %169 = vmatpush1.msra.mxu1 %v453_v24  ;;  %v472_v6 = vld [vmem:[%s892_s0 + $0x138] sm:$0xff]  ;;  %v471_v9 = vld [vmem:[%s892_s0 + $0x130] sm:$0xff]  ;;  %v493_v10 = vld [vmem:[%s892_s0 + $0x1c8] sm:$0xff] }
  0x19   :  { %72 = vmatprep.subr.mxu0 %v518_v0  ;;  %170 = vmatprep.subr.mxu1 %v518_v0  ;;  %v17_v8 = vld [vmem:[%s893_s1 + $0x18] sm:$0xff]  ;;  %v16_v11 = vld [vmem:[%s893_s1 + $0x10] sm:$0xff]  ;;  %v489_v12 = vld [vmem:[%s892_s0 + $0x1c0] sm:$0x3f] }
  0x1a   :  { %73 = vmatpush1.msra.mxu0 %v21_v25  ;;  %171 = vmatpush1.msra.mxu1 %v452_v26  ;;  %v511_v13 = vld [vmem:[%s892_s0 + $0x258] sm:$0x3f]  ;;  %v510_v15 = vld [vmem:[%s892_s0 + $0x250] sm:$0xff]  ;;  %v509_v17 = vld [vmem:[%s892_s0 + $0x248] sm:$0xff] }
  0x1b   :  { %74 = vmatprep.subr.mxu0 %v518_v0  ;;  %172 = vmatprep.subr.mxu1 %v518_v0  ;;  %v488_v14 = vld [vmem:[%s892_s0 + $0x1b8] sm:$0xff]  ;;  %v487_v16 = vld [vmem:[%s892_s0 + $0x1b0] sm:$0xff]  ;;  %v423_v18 = vld [vmem:[%s894_s2] sm:$0xff] }
  0x1c   :  { %75 = vmatpush1.msra.mxu0 %v20_v27  ;;  %173 = vmatpush1.msra.mxu1 %v451_v28  ;;  %v424_v19 = vld [vmem:[%s894_s2 + $0x8] sm:$0xff] }
  0x1d   :  { %76 = vmatprep.subr.mxu0 %v518_v0  ;;  %174 = vmatprep.subr.mxu1 %v518_v0 }
  0x1e   :  { %77 = vmatpush1.msra.mxu0 %v19_v29  ;;  %175 = vmatpush1.msra.mxu1 %v450_v30 }
  0x1f   :  { %78 = vmatprep.subr.mxu0 %v518_v0  ;;  %176 = vmatprep.subr.mxu1 %v518_v0 }
  0x20   :  { %79 = vmatpush1.msra.mxu0 %v18_v31  ;;  %177 = vmatpush1.msra.mxu1 %v449_v32 }
  0x21   :  { %106 = vmatprep.subr.mxu0 %v518_v0  ;;  %204 = vmatprep.subr.mxu1 %v518_v0 }
  0x22   :  { %446 = vmatpush2.msk.msra.mxu0 %vm44_vm0, %v36_v33  ;;  %468 = vmatpush2.msk.msra.mxu1 %vm44_vm0, %v467_v34 }
  0x23   :  { %108 = vmatprep.subr.mxu0 %v518_v0  ;;  %206 = vmatprep.subr.mxu1 %v518_v0 }
  0x24   :  { %109 = vmatpush2.msra.mxu0 %v35_v35  ;;  %207 = vmatpush2.msra.mxu1 %v466_v36 }
  0x25   :  { %110 = vmatprep.subr.mxu0 %v518_v0  ;;  %208 = vmatprep.subr.mxu1 %v518_v0 }
  0x26   :  { %111 = vmatpush2.msra.mxu0 %v34_v37  ;;  %447 = vmatprep.mubr.msk.f32.mxu0 %vm37_vm1, %v692_v38 }
  0x27   :  { %209 = vmatpush2.msra.mxu1 %v465_v39  ;;  %113 = vmatmul.mubr.f32.vlgmr.msra.gmra.mxu0 %v700_v40 }
  0x28   :  { %469 = vmatprep.mubr.msk.f32.mxu1 %vm37_vm1, %v692_v38  ;;  %246 = vmatprep.subr.mxu0 %v518_v0 }
  0x29   :  { %346 = vmatprep.subr.mxu1 %v518_v0  ;;  %211 = vmatmul.mubr.f32.vlgmr.msra.gmra.mxu1 %v700_v40 }
  0x2a   :  { %247 = vmatpush1.msra.mxu0 %v486_v41  ;;  %347 = vmatpush1.msra.mxu1 %v508_v42 }
  0x2b   :  { %248 = vmatprep.subr.mxu0 %v518_v0  ;;  %348 = vmatprep.subr.mxu1 %v518_v0 }
  0x2c   :  { %249 = vmatpush1.msra.mxu0 %v485_v43  ;;  %349 = vmatpush1.msra.mxu1 %v507_v44 }
  0x2d   :  { %250 = vmatprep.subr.mxu0 %v518_v0  ;;  %350 = vmatprep.subr.mxu1 %v518_v0 }
  0x2e   :  { %251 = vmatpush1.msra.mxu0 %v484_v45  ;;  %351 = vmatpush1.msra.mxu1 %v506_v46 }
  0x2f   :  { %252 = vmatprep.subr.mxu0 %v518_v0  ;;  %352 = vmatprep.subr.mxu1 %v518_v0 }
  0x30   :  { %253 = vmatpush1.msra.mxu0 %v483_v47  ;;  %353 = vmatpush1.msra.mxu1 %v505_v48 }
  0x31   :  { %254 = vmatprep.subr.mxu0 %v518_v0  ;;  %354 = vmatprep.subr.mxu1 %v518_v0 }
  0x32   :  { %255 = vmatpush1.msra.mxu0 %v482_v49  ;;  %355 = vmatpush1.msra.mxu1 %v504_v50 }
  0x33   :  { %256 = vmatprep.subr.mxu0 %v518_v0  ;;  %356 = vmatprep.subr.mxu1 %v518_v0 }
  0x34   :  { %257 = vmatpush1.msra.mxu0 %v481_v51  ;;  %357 = vmatpush1.msra.mxu1 %v503_v52 }
  0x35   :  { %258 = vmatprep.subr.mxu0 %v518_v0  ;;  %358 = vmatprep.subr.mxu1 %v518_v0 }
  0x36   :  { %259 = vmatpush1.msra.mxu0 %v480_v53  ;;  %359 = vmatpush1.msra.mxu1 %v502_v54 }
  0x37   :  { %260 = vmatprep.subr.mxu0 %v518_v0  ;;  %360 = vmatprep.subr.mxu1 %v518_v0 }
  0x38   :  { %261 = vmatpush1.msra.mxu0 %v479_v55  ;;  %361 = vmatpush1.msra.mxu1 %v501_v56 }
  0x39   :  { %262 = vmatprep.subr.mxu0 %v518_v0  ;;  %362 = vmatprep.subr.mxu1 %v518_v0 }
  0x3a   :  { %263 = vmatpush1.msra.mxu0 %v478_v57  ;;  %363 = vmatpush1.msra.mxu1 %v500_v58 }
  0x3b   :  { %264 = vmatprep.subr.mxu0 %v518_v0  ;;  %364 = vmatprep.subr.mxu1 %v518_v0 }
  0x3c   :  { %265 = vmatpush1.msra.mxu0 %v477_v59  ;;  %365 = vmatpush1.msra.mxu1 %v499_v60 }
  0x3d   :  { %266 = vmatprep.subr.mxu0 %v518_v0  ;;  %366 = vmatprep.subr.mxu1 %v518_v0 }
  0x3e   :  { %267 = vmatpush1.msra.mxu0 %v476_v61  ;;  %367 = vmatpush1.msra.mxu1 %v498_v62 }
  0x3f   :  { %268 = vmatprep.subr.mxu0 %v518_v0  ;;  %368 = vmatprep.subr.mxu1 %v518_v0 }
  0x40   :  { %269 = vmatpush1.msra.mxu0 %v475_v63  ;;  %369 = vmatpush1.msra.mxu1 %v497_v1 }
  0x41   :  { %270 = vmatprep.subr.mxu0 %v518_v0  ;;  %370 = vmatprep.subr.mxu1 %v518_v0 }
  0x42   :  { %271 = vmatpush1.msra.mxu0 %v474_v2  ;;  %371 = vmatpush1.msra.mxu1 %v496_v3 }
  0x43   :  { %272 = vmatprep.subr.mxu0 %v518_v0  ;;  %372 = vmatprep.subr.mxu1 %v518_v0 }
  0x44   :  { %273 = vmatpush1.msra.mxu0 %v473_v4  ;;  %373 = vmatpush1.msra.mxu1 %v495_v5 }
  0x45   :  { %274 = vmatprep.subr.mxu0 %v518_v0  ;;  %374 = vmatprep.subr.mxu1 %v518_v0 }
  0x46   :  { %275 = vmatpush1.msra.mxu0 %v472_v6  ;;  %375 = vmatpush1.msra.mxu1 %v494_v7 }
  0x47   :  { %276 = vmatprep.subr.mxu0 %v518_v0  ;;  %376 = vmatprep.subr.mxu1 %v518_v0 }
  0x48   :  { %448 = vmatprep.mubr.msk.f32.mxu0 %vm37_vm1, %v17_v8  ;;  %277 = vmatpush1.msra.mxu0 %v471_v9 }
  0x49   :  { %377 = vmatpush1.msra.mxu1 %v493_v10  ;;  %118 = vmatmul.mubr.f32.gmra.mxu0 %v16_v11 }
  0x4a   :  { %304 = vmatprep.subr.mxu0 %v518_v0  ;;  %404 = vmatprep.subr.mxu1 %v518_v0 }
  0x4b   :  { %470 = vmatprep.mubr.msk.f32.mxu1 %vm37_vm1, %v17_v8  ;;  %490 = vmatpush2.msk.msra.mxu0 %vm44_vm0, %v489_v12 }
  0x4c   :  { %512 = vmatpush2.msk.msra.mxu1 %vm44_vm0, %v511_v13  ;;  %306 = vmatprep.subr.mxu0 %v518_v0 }
  0x4d   :  { %216 = vmatmul.mubr.f32.gmra.mxu1 %v16_v11  ;;  %406 = vmatprep.subr.mxu1 %v518_v0 }
  0x4e   :  { %307 = vmatpush2.msra.mxu0 %v488_v14  ;;  %407 = vmatpush2.msra.mxu1 %v510_v15 }
  0x4f   :  { %308 = vmatprep.subr.mxu0 %v518_v0  ;;  %408 = vmatprep.subr.mxu1 %v518_v0  ;;  %v519_v0 = vmov 0  }
  0x50   :  { %309 = vmatpush2.msra.mxu0 %v487_v16  ;;  %491 = vmatprep.mubr.msk.f32.mxu0 %vm37_vm1, %v692_v38 }
  0x51   :  { %409 = vmatpush2.msra.mxu1 %v509_v17  ;;  %513 = vmatprep.mubr.msk.f32.mxu1 %vm37_vm1, %v692_v38 }
  0x52   :  { %311 = vmatmul.mubr.f32.vlgmr.msra.gmra.mxu0 %v700_v40  ;;  %411 = vmatmul.mubr.f32.vlgmr.msra.gmra.mxu1 %v700_v40 }
  0x53   :  { %492 = vmatprep.mubr.msk.f32.mxu0 %vm37_vm1, %v17_v8  ;;  %514 = vmatprep.mubr.msk.f32.mxu1 %vm37_vm1, %v17_v8 }
  0x54   :  { %517 = vset.pattern.permute.xlu0 %v519_v0 }
  0x55   :  { %427 = vperm.xlu0 %517, %v423_v18  }
  0x56   :  { %316 = vmatmul.mubr.f32.gmra.mxu0 %v16_v11  ;;  %416 = vmatmul.mubr.f32.gmra.mxu1 %v16_v11 }
  0x59   :  { %432 = vperm.xlu0 %517, %v424_v19  }
  0xd0   :  { %v428_v31 = vpop.permute.xlu0 %427 }
  0xd4   :  { %v433_v45 = vpop.permute.xlu0 %432 }
  0xe7   :  { %v114_v20 = vpop.f32.mrf.mxu0 }
  0xe9   :  { %v212_v21 = vpop.f32.mrf.mxu1  ;;  %v116_v22 = vpop.f32.mrf.mxu0 }
  0xea   :  { %v221_v28 = vmax.f32 %v114_v20, %v212_v21 }
  0xeb   :  { %v214_v23 = vpop.f32.mrf.mxu1 }
 0x109   :  { %v119_v24 = vpop.f32.mrf.mxu0 }
 0x10b   :  { %v121_v25 = vpop.f32.mrf.mxu0 }
 0x10d   :  { %v217_v26 = vpop.f32.mrf.mxu1 }
 0x10e   :  { %v222_v35 = vmax.f32 %v119_v24, %v217_v26 }
 0x10f   :  { %v219_v27 = vpop.f32.mrf.mxu1 }
 0x112   :  { %v312_v29 = vpop.f32.mrf.mxu0  ;;  %v412_v30 = vpop.f32.mrf.mxu1 }
 0x113   :  { %v321_v32 = vmax.f32 %v221_v28, %v312_v29 }
 0x114   :  { %v314_v33 = vpop.f32.mrf.mxu0  ;;  %v414_v34 = vpop.f32.mrf.mxu1 }
 0x115   :  { %v421_v36 = vmax.f32 %v321_v32, %v412_v30 }
 0x116   :  { %v317_v37 = vpop.f32.mrf.mxu0  ;;  %v417_v38 = vpop.f32.mrf.mxu1 }
 0x117   :  { %v435_v39 = vadd.f32 %v428_v31, %v421_v36  ;;  %v322_v40 = vmax.f32 %v222_v35, %v317_v37 }
 0x118   :  { %v319_v41 = vpop.f32.mrf.mxu0  ;;  %v419_v42 = vpop.f32.mrf.mxu1 }
 0x119   :  { %v437_v43 = vmax.f32 %v435_v39, 0.0  ;;  %v422_v44 = vmax.f32 %v322_v40, %v417_v38 }
 0x11b   :  { %440 = vst.msk [vmem:[%s895_s3] sm:$0xff] %vm439_vm2, %v437_v43  ;;  %v436_v46 = vadd.f32 %v433_v45, %v422_v44 }
 0x11d   :  { %v438_v47 = vmax.f32 %v436_v46, 0.0 }
 0x11f   :  { %441 = vst.msk [vmem:[%s895_s3 + $0x8] sm:$0xff] %vm439_vm2, %v438_v47 }

// kernel: net_forward.5
= control target key start
LH: loop header
LB: loop body
LE: loop exit
PB: predicated region body
PF: predicated region fallthrough
CT: control target
= control target key end

     0   :  { %v614_v3 = vmov 0.0   ;;  %v615_v23 = vmov 1983009808   ;;  %v90_v25 = vlaneseq  ;;  %s947_s0 = inlined_call_operand.vmem [shape: f32[2,400], index: 0, kind: input, shape index: {}]   ;;  %s948_s1 = inlined_call_operand.vmem [shape: f32[400,120], index: 1, kind: input, shape index: {}]   ;;  %s949_s2 = inlined_call_operand.vmem [shape: f32[1,120], index: 2, kind: input, shape index: {}]   ;;  %s950_s3 = inlined_call_operand.vmem [shape: f32[120,84], index: 3, kind: input, shape index: {}]   ;;  %s951_s4 = inlined_call_operand.vmem [shape: f32[1,84], index: 4, kind: input, shape index: {}]   ;;  %s952_s5 = inlined_call_operand.vmem [shape: f32[84,10], index: 5, kind: input, shape index: {}]   ;;  %s953_s6 = inlined_call_operand.vmem [shape: f32[1,10], index: 6, kind: input, shape index: {}]   ;;  %s954_s7 = inlined_call_operand.hbm [shape: f32[2,10], index: 7, kind: output, shape index: {}]  }
   0x1   :  { %v59_v0 = vld [vmem:[%s948_s1 + $0xf8] sm:$0xff]  ;;  %179 = vmatprep.subr.mxu1 %v614_v3  ;;  %v58_v4 = vld [vmem:[%s948_s1 + $0xf0] sm:$0xff]  ;;  %v57_v7 = vld [vmem:[%s948_s1 + $0xe8] sm:$0xff]  ;;  %v88_v24 = vunpack.c.l.s4 %v615_v23 }
   0x2   :  { %v43_v1 = vld [vmem:[%s948_s1 + $0x78] sm:$0xff]  ;;  %466 = vmatprep.subr.mxu0 %v59_v0  ;;  %v42_v5 = vld [vmem:[%s948_s1 + $0x70] sm:$0xff]  ;;  %v41_v8 = vld [vmem:[%s948_s1 + $0x68] sm:$0xff]  ;;  %v91_v33 = vshrl.u32 %v90_v25, 7 }
   0x3   :  { %v75_v2 = vld [vmem:[%s948_s1 + $0x178] sm:$0xff]  ;;  %v74_v6 = vld [vmem:[%s948_s1 + $0x170] sm:$0xff]  ;;  %467 = vmatpush3.msra.mxu0 %v43_v1  ;;  %v73_v9 = vld [vmem:[%s948_s1 + $0x168] sm:$0xff]  ;;  %v89_v32 = vunpack.c.0.s8 %v88_v24 }
   0x4   :  { %180 = vmatpush1.msra.mxu1 %v75_v2  ;;  %468 = vmatprep.subr.mxu0 %v58_v4  ;;  %v56_v10 = vld [vmem:[%s948_s1 + $0xe0] sm:$0xff]  ;;  %v55_v13 = vld [vmem:[%s948_s1 + $0xd8] sm:$0xff]  ;;  %v54_v16 = vld [vmem:[%s948_s1 + $0xd0] sm:$0xff] }
   0x5   :  { %181 = vmatprep.subr.mxu1 %v614_v3  ;;  %469 = vmatpush3.msra.mxu0 %v42_v5  ;;  %v40_v11 = vld [vmem:[%s948_s1 + $0x60] sm:$0xff]  ;;  %v39_v14 = vld [vmem:[%s948_s1 + $0x58] sm:$0xff]  ;;  %v38_v17 = vld [vmem:[%s948_s1 + $0x50] sm:$0xff]  ;;  %v92_v40 = vsub.s32 %v89_v32, %v91_v33 }
   0x6   :  { %182 = vmatpush1.msra.mxu1 %v74_v6  ;;  %470 = vmatprep.subr.mxu0 %v57_v7  ;;  %v72_v12 = vld [vmem:[%s948_s1 + $0x160] sm:$0xff]  ;;  %v71_v15 = vld [vmem:[%s948_s1 + $0x158] sm:$0xff]  ;;  %v70_v18 = vld [vmem:[%s948_s1 + $0x150] sm:$0xff] }
   0x7   :  { %183 = vmatprep.subr.mxu1 %v614_v3  ;;  %471 = vmatpush3.msra.mxu0 %v41_v8  ;;  %v53_v19 = vld [vmem:[%s948_s1 + $0xc8] sm:$0xff]  ;;  %v52_v22 = vld [vmem:[%s948_s1 + $0xc0] sm:$0xff]  ;;  %v51_v28 = vld [vmem:[%s948_s1 + $0xb8] sm:$0xff] }
   0x8   :  { %184 = vmatpush1.msra.mxu1 %v73_v9  ;;  %472 = vmatprep.subr.mxu0 %v56_v10  ;;  %v37_v20 = vld [vmem:[%s948_s1 + $0x48] sm:$0xff]  ;;  %v36_v26 = vld [vmem:[%s948_s1 + $0x40] sm:$0xff]  ;;  %v35_v29 = vld [vmem:[%s948_s1 + $0x38] sm:$0xff] }
   0x9   :  { %185 = vmatprep.subr.mxu1 %v614_v3  ;;  %473 = vmatpush3.msra.mxu0 %v40_v11  ;;  %v69_v21 = vld [vmem:[%s948_s1 + $0x148] sm:$0xff]  ;;  %v68_v27 = vld [vmem:[%s948_s1 + $0x140] sm:$0xff]  ;;  %v67_v30 = vld [vmem:[%s948_s1 + $0x138] sm:$0xff] }
   0xa   :  { %186 = vmatpush1.msra.mxu1 %v72_v12  ;;  %474 = vmatprep.subr.mxu0 %v55_v13  ;;  %v50_v31 = vld [vmem:[%s948_s1 + $0xb0] sm:$0xff]  ;;  %v49_v36 = vld [vmem:[%s948_s1 + $0xa8] sm:$0xff]  ;;  %v48_v39 = vld [vmem:[%s948_s1 + $0xa0] sm:$0xff] }
   0xb   :  { %187 = vmatprep.subr.mxu1 %v614_v3  ;;  %475 = vmatpush3.msra.mxu0 %v39_v14  ;;  %v34_v34 = vld [vmem:[%s948_s1 + $0x30] sm:$0xff]  ;;  %v33_v37 = vld [vmem:[%s948_s1 + $0x28] sm:$0xff] }
   0xc   :  { %188 = vmatpush1.msra.mxu1 %v71_v15  ;;  %476 = vmatprep.subr.mxu0 %v54_v16  ;;  %v66_v35 = vld [vmem:[%s948_s1 + $0x130] sm:$0xff]  ;;  %v65_v38 = vld [vmem:[%s948_s1 + $0x128] sm:$0xff] }
   0xd   :  { %189 = vmatprep.subr.mxu1 %v614_v3  ;;  %477 = vmatpush3.msra.mxu0 %v38_v17 }
   0xe   :  { %190 = vmatpush1.msra.mxu1 %v70_v18  ;;  %478 = vmatprep.subr.mxu0 %v53_v19 }
   0xf   :  { %191 = vmatprep.subr.mxu1 %v614_v3  ;;  %479 = vmatpush3.msra.mxu0 %v37_v20 }
  0x10   :  { %192 = vmatpush1.msra.mxu1 %v69_v21  ;;  %480 = vmatprep.subr.mxu0 %v52_v22 }
  0x11   :  { %193 = vmatprep.subr.mxu1 %v614_v3  ;;  %481 = vmatpush3.msra.mxu0 %v36_v26 }
  0x12   :  { %194 = vmatpush1.msra.mxu1 %v68_v27  ;;  %482 = vmatprep.subr.mxu0 %v51_v28 }
  0x13   :  { %195 = vmatprep.subr.mxu1 %v614_v3  ;;  %483 = vmatpush3.msra.mxu0 %v35_v29 }
  0x14   :  { %196 = vmatpush1.msra.mxu1 %v67_v30  ;;  %484 = vmatprep.subr.mxu0 %v50_v31 }
  0x15   :  { %197 = vmatprep.subr.mxu1 %v614_v3  ;;  %485 = vmatpush3.msra.mxu0 %v34_v34 }
  0x16   :  { %198 = vmatpush1.msra.mxu1 %v66_v35 }
  0x17   :  { %12 = vsyncpa [#allocation3], 0  ;;  %486 = vmatprep.subr.mxu0 %v49_v36  ;;  %199 = vmatprep.subr.mxu1 %v614_v3  ;;  %v32_v41 = vld [vmem:[%s948_s1 + $0x20] sm:$0xff]  ;;  %v47_v44 = vld [vmem:[%s948_s1 + $0x98] sm:$0xff]  ;;  %vm106_vm0 = vcmask 130048   ;;  %vm616_vm1 = vmmov 0  }
  0x18   :  { %v64_v42 = vld [vmem:[%s948_s1 + $0x120] sm:$0xff]  ;;  %487 = vmatpush3.msra.mxu0 %v33_v37  ;;  %200 = vmatpush1.msra.mxu1 %v65_v38  ;;  %v31_v46 = vld [vmem:[%s948_s1 + $0x18] sm:$0xff]  ;;  %v46_v48 = vld [vmem:[%s948_s1 + $0x90] sm:$0xff]  ;;  %vm369_vm2 = vcmask 1043456   ;;  %vm272_vm3 = vcmask 982016   ;;  %vm365_vm4 = vcmask 687104  }
  0x19   :  { %v27_v43 = vld [vmem:[%s947_s0] sm:$0xff]  ;;  %488 = vmatprep.subr.mxu0 %v48_v39  ;;  %201 = vmatprep.subr.mxu1 %v614_v3  ;;  %v63_v47 = vld [vmem:[%s948_s1 + $0x118] sm:$0xff]  ;;  %v30_v50 = vld [vmem:[%s948_s1 + $0x10] sm:$0xff]  ;;  %vm443_vm5 = vcmask 74752  }
  0x1a   :  { %v86_v45 = vcombine.high %v27_v43, %v27_v43  ;;  %489 = vmatpush3.msra.mxu0 %v32_v41  ;;  %202 = vmatpush1.msra.mxu1 %v64_v42  ;;  %v93_v49 = vrot.slane %v27_v43, %v92_v40  ;;  %v62_v51 = vld [vmem:[%s948_s1 + $0x110] sm:$0xff]  ;;  %v45_v52 = vld [vmem:[%s948_s1 + $0x88] sm:$0xff]  ;;  %v44_v56 = vld [vmem:[%s948_s1 + $0x80] sm:$0xff] }
  0x1b   :  { %490 = vmatprep.subr.mxu0 %v47_v44  ;;  %203 = vmatprep.subr.mxu1 %v614_v3  ;;  %v29_v54 = vld [vmem:[%s948_s1 + $0x8] sm:$0xff]  ;;  %v28_v58 = vld [vmem:[%s948_s1] sm:$0xff]  ;;  %v264_v62 = vld [vmem:[%s950_s3 + $0x70] sm:$0xff] }
  0x1c   :  { %491 = vmatpush3.msra.mxu0 %v31_v46  ;;  %204 = vmatpush1.msra.mxu1 %v63_v47  ;;  %v100_v53 = vrot.slane %v86_v45, %v92_v40  ;;  %v61_v55 = vld [vmem:[%s948_s1 + $0x108] sm:$0xff]  ;;  %v101_v57 = vcombine.high %v93_v49, %v93_v49  ;;  %v60_v59 = vld [vmem:[%s948_s1 + $0x100] sm:$0xff]  ;;  %v261_v2 = vld [vmem:[%s950_s3 + $0x58] sm:$0xff] }
  0x1d   :  { %492 = vmatprep.subr.mxu0 %v46_v48  ;;  %205 = vmatprep.subr.mxu1 %v614_v3  ;;  %v77_v61 = vld [vmem:[%s948_s1 + $0x188] sm:$0xff]  ;;  %v76_v63 = vld [vmem:[%s948_s1 + $0x180] sm:$0xff]  ;;  %v260_v4 = vld [vmem:[%s950_s3 + $0x50] sm:$0xff]  ;;  %s617_s1 = smov [#allocation2]  }
  0x1e   :  { %493 = vmatpush3.msra.mxu0 %v30_v50  ;;  %206 = vmatpush1.msra.mxu1 %v62_v51  ;;  %v102_v60 = vcombine.high %v100_v53, %v100_v53  ;;  %v263_v0 = vld [vmem:[%s950_s3 + $0x68] sm:$0xff]  ;;  %v262_v1 = vld [vmem:[%s950_s3 + $0x60] sm:$0xff]  ;;  %v257_v7 = vld [vmem:[%s950_s3 + $0x38] sm:$0xff]  ;;  %s451_s15 = sshll.u32 %s617_s1, 4  ;;  %s452_s15 = int_to_ptr.vmem [resolvable:$true] %s451_s15 }
  0x1f   :  { %494 = vmatprep.subr.mxu0 %v45_v52  ;;  %207 = vmatprep.subr.mxu1 %v614_v3  ;;  %v259_v5 = vld [vmem:[%s950_s3 + $0x48] sm:$0xff]  ;;  %v258_v6 = vld [vmem:[%s950_s3 + $0x40] sm:$0xff]  ;;  %v256_v8 = vld [vmem:[%s950_s3 + $0x30] sm:$0xff]  ;;  %p597_p1 = scmp.lt.s32.totalorder %s452_s15, %s452_s15 }
  0x20   :  { %495 = vmatpush3.msra.mxu0 %v29_v54  ;;  %208 = vmatpush1.msra.mxu1 %v61_v55  ;;  %v255_v9 = vld [vmem:[%s950_s3 + $0x28] sm:$0xff]  ;;  %v254_v10 = vld [vmem:[%s950_s3 + $0x20] sm:$0xff]  ;;  %v253_v11 = vld [vmem:[%s950_s3 + $0x18] sm:$0xff] }
  0x21   :  { %496 = vmatprep.subr.mxu0 %v44_v56  ;;  %209 = vmatprep.subr.mxu1 %v614_v3  ;;  %v252_v12 = vld [vmem:[%s950_s3 + $0x10] sm:$0xff]  ;;  %v251_v13 = vld [vmem:[%s950_s3 + $0x8] sm:$0xff]  ;;  %v250_v14 = vld [vmem:[%s950_s3] sm:$0xff] }
  0x22   :  { %497 = vmatpush3.msra.mxu0 %v28_v58  ;;  %173 = vmatprep.mubr.f32.mxu0 %v101_v57  ;;  %v357_v15 = vld [vmem:[%s952_s5 + $0x50] sm:$0xf]  ;;  %v356_v16 = vld [vmem:[%s952_s5 + $0x48] sm:$0xff]  ;;  %v355_v17 = vld [vmem:[%s952_s5 + $0x40] sm:$0xff] }
  0x23   :  { %210 = vmatpush1.msra.mxu1 %v60_v59  ;;  %174 = vmatmul.mubr.f32.vlgmr.msra.gmra.mxu0 %v93_v49  ;;  %v354_v18 = vld [vmem:[%s952_s5 + $0x38] sm:$0xff]  ;;  %v353_v19 = vld [vmem:[%s952_s5 + $0x30] sm:$0xff]  ;;  %v352_v20 = vld [vmem:[%s952_s5 + $0x28] sm:$0xff] }
  0x24   :  { %239 = vmatprep.subr.mxu1 %v614_v3  ;;  %460 = vmatprep.mubr.msk.f32.mxu1 %vm106_vm0, %v102_v60  ;;  %v351_v21 = vld [vmem:[%s952_s5 + $0x20] sm:$0xff]  ;;  %v350_v22 = vld [vmem:[%s952_s5 + $0x18] sm:$0xff]  ;;  %v349_v32 = vld [vmem:[%s952_s5 + $0x10] sm:$0xff] }
  0x25   :  { %240 = vmatpush2.msra.mxu1 %v77_v61  ;;  %529 = vmatprep.subr.mxu0 %v614_v3  ;;  %v459_v25 = vld [vmem:[%s949_s2] ss:$0 sm:$0xff]  ;;  %v348_v33 = vld [vmem:[%s952_s5 + $0x8] sm:$0xff] }
  0x26   :  { %241 = vmatprep.subr.mxu1 %v614_v3  ;;  %530 = vmatpush3.msra.mxu0 %v264_v62  ;;  %v347_v34 = vld [vmem:[%s952_s5] sm:$0xff]  ;;  %s592_s5 = scalar_lea.vmem %s452_s15, 32 }
  0x27   :  { %242 = vmatpush2.msra.mxu1 %v76_v63  ;;  %531 = vmatprep.subr.mxu0 %v614_v3  ;;  %v461_v35 = vld [vmem:[%s951_s4] ss:$0 sm:$0xff]  ;;  %p593_p0 = scmp.ne.s32.totalorder %s452_s15, %s592_s5  ;;  %p598_p2 = scmp.lt.s32.totalorder %s592_s5, %s592_s5 }
  0x28   :  { %244 = vmatmul.mubr.f32.vlgmr.msra.gmra.mxu1 %v100_v53  ;;  %532 = vmatpush3.msra.mxu0 %v263_v0  ;;  %v463_v40 = vld [vmem:[%s953_s6] ss:$0 sm:$0xff] }
  0x29   :  { %533 = vmatprep.subr.mxu0 %v614_v3  ;;  %562 = vmatprep.subr.mxu1 %v614_v3  ;;  %p599_p3 = por %p598_p2, %p597_p1 }
  0x2a   :  { %534 = vmatpush3.msra.mxu0 %v262_v1  ;;  %559 = vmatprep.mubr.msk.f32.mxu0 %vm616_vm1, %v614_v3 }
  0x2b   :  { %535 = vmatprep.subr.mxu0 %v614_v3  ;;  %584 = vmatprep.mubr.msk.f32.mxu1 %vm616_vm1, %v614_v3  ;;  %p600_p4 = pnand %p599_p3, %p593_p0 }
  0x2c   :  { %536 = vmatpush3.msra.mxu0 %v261_v2  ;;  %563 = vmatpush3.msk.msra.mxu1 %vm369_vm2, %v357_v15 }
  0x2d   :  { %537 = vmatprep.subr.mxu0 %v614_v3  ;;  %564 = vmatprep.subr.mxu1 %v614_v3 }
  0x2e   :  { %538 = vmatpush3.msra.mxu0 %v260_v4  ;;  %565 = vmatpush3.msra.mxu1 %v356_v16 }
  0x2f   :  { %539 = vmatprep.subr.mxu0 %v614_v3  ;;  %566 = vmatprep.subr.mxu1 %v614_v3 }
  0x30   :  { %540 = vmatpush3.msra.mxu0 %v259_v5  ;;  %567 = vmatpush3.msra.mxu1 %v355_v17 }
  0x31   :  { %541 = vmatprep.subr.mxu0 %v614_v3  ;;  %568 = vmatprep.subr.mxu1 %v614_v3 }
  0x32   :  { %542 = vmatpush3.msra.mxu0 %v258_v6  ;;  %569 = vmatpush3.msra.mxu1 %v354_v18 }
  0x33   :  { %543 = vmatprep.subr.mxu0 %v614_v3  ;;  %570 = vmatprep.subr.mxu1 %v614_v3 }
  0x34   :  { %544 = vmatpush3.msra.mxu0 %v257_v7  ;;  %571 = vmatpush3.msra.mxu1 %v353_v19 }
  0x35   :  { %545 = vmatprep.subr.mxu0 %v614_v3  ;;  %572 = vmatprep.subr.mxu1 %v614_v3 }
  0x36   :  { %546 = vmatpush3.msra.mxu0 %v256_v8  ;;  %573 = vmatpush3.msra.mxu1 %v352_v20 }
  0x37   :  { %547 = vmatprep.subr.mxu0 %v614_v3  ;;  %574 = vmatprep.subr.mxu1 %v614_v3 }
  0x38   :  { %548 = vmatpush3.msra.mxu0 %v255_v9  ;;  %575 = vmatpush3.msra.mxu1 %v351_v21 }
  0x39   :  { %549 = vmatprep.subr.mxu0 %v614_v3  ;;  %576 = vmatprep.subr.mxu1 %v614_v3 }
  0x3a   :  { %550 = vmatpush3.msra.mxu0 %v254_v10  ;;  %577 = vmatpush3.msra.mxu1 %v350_v22 }
  0x3b   :  { %551 = vmatprep.subr.mxu0 %v614_v3  ;;  %578 = vmatprep.subr.mxu1 %v614_v3 }
  0x3c   :  { %552 = vmatpush3.msra.mxu0 %v253_v11  ;;  %579 = vmatpush3.msra.mxu1 %v349_v32 }
  0x3d   :  { %553 = vmatprep.subr.mxu0 %v614_v3  ;;  %580 = vmatprep.subr.mxu1 %v614_v3 }
  0x3e   :  { %554 = vmatpush3.msra.mxu0 %v252_v12  ;;  %581 = vmatpush3.msra.mxu1 %v348_v33 }
  0x3f   :  { %555 = vmatprep.subr.mxu0 %v614_v3  ;;  %582 = vmatprep.subr.mxu1 %v614_v3 }
  0x40   :  { %556 = vmatpush3.msra.mxu0 %v251_v13  ;;  %583 = vmatpush3.msra.mxu1 %v347_v34 }
  0x41   :  { %557 = vmatprep.subr.mxu0 %v614_v3 }
  0x42   :  { %558 = vmatpush3.msra.mxu0 %v250_v14 }
  0xe3   :  { %v498_v23 = vpop.f32.mrf.mxu0 }
  0xe5   :  { %v499_v24 = vpop.f32.mrf.mxu0 }
  0xe6   :  { %v500_v26 = vadd.f32 %v499_v24, %v498_v23 }
  0xe8   :  { %v176_v27 = vadd.f32 %v500_v26, %v459_v25  ;;  %v245_v28 = vpop.f32.mrf.mxu1 }
  0xea   :  { %v246_v29 = vadd.f32 %v245_v28, %v176_v27  ;;  %v247_v30 = vpop.f32.mrf.mxu1 }
  0xec   :  { %v249_v31 = vmax.f32 %v246_v29, 0.0 }
  0xee   :  { %560 = vmatmul.mubr.msk.f32.vlgmr.msra.gmra.mxu0 %vm272_vm3, %v249_v31 }
 0x1ae   :  { %v342_v36 = vpop.f32.mrf.mxu0 }
 0x1af   :  { %v343_v37 = vadd.f32 %v461_v35, %v342_v36 }
 0x1b0   :  { %v561_v38 = vpop.f32.mrf.mxu0 }
 0x1b1   :  { %v346_v39 = vmax.f32 %v343_v37, 0.0 }
 0x1b3   :  { %585 = vmatmul.mubr.msk.f32.vlgmr.msra.gmra.mxu1 %vm365_vm4, %v346_v39 }
 0x273   :  { %v439_v41 = vpop.f32.mrf.mxu1 }
 0x274   :  { %v440_v3 = vadd.f32 %v463_v40, %v439_v41 }
 0x275   :  { %v586_v42 = vpop.f32.mrf.mxu1 }
 0x276   :  { %444 = vst.msk [vmem:[#allocation2] sm:$0x3] %vm443_vm5, %v440_v3 }
 0x277   :  { %603 = shalt.err (!%p600_p4)
}
 0x278   :  { %454 = dma.vmem_to_hbm [thread:$0]  %s452_s15, 32, %s954_s7, [#allocation3]  }
 0x279   :  { %612 = dma.done.wait [#allocation3], 32  }
 0x27a   :  { %613 = vsyncadd [#allocation3], 4294967264 }
 0x27b   :  { %458 = vsyncpa [#allocation3], 1 }

</bundles_post_ra>
